<compile_context>
chip_gen: v6e
topology: v6e:2x2x1
jax: 0.10.0
libtpu: 0.0.40
codegen_flags: <defaults>
</compile_context>

<pallas_src>
import functools
import math

import jax
import jax.numpy as jnp
from jax.experimental import pallas as pl
from jax.experimental.pallas import tpu as pltpu


def _round_up(v, m):
    return (v + m - 1) // m * m


def _gelu(v, approximate):
    if approximate:
        # tanh approximation: cheap on the VPU, transcendental goes to EUP.
        c = jnp.asarray(math.sqrt(2.0 / math.pi), dtype=v.dtype)
        return 0.5 * v * (1.0 + jnp.tanh(c * (v + 0.044715 * (v * v * v))))
    # exact erf form (matches torch.nn.GELU() bit-for-bit in f32, but the erf
    # polynomial is VALU-heavy).
    inv_sqrt2 = jnp.asarray(1.0 / math.sqrt(2.0), dtype=v.dtype)
    return 0.5 * v * (1.0 + jax.lax.erf(v * inv_sqrt2))


def _mlp_kernel(x_ref,
                w1_ref, b1_ref,
                w2_ref, b2_ref,
                w3_ref, b3_ref,
                w4_ref, b4_ref,
                w5_ref, b5_ref,
                o_ref,
                *, approximate_gelu):
    def layer(h, w_ref, b_ref):
        # bf16 x bf16 on the MXU, f32 accumulation; bias-add + GELU on the f32
        # accumulator (also valid on v5e, which has no bf16 VPU path).
        z = jnp.dot(h, w_ref[...], preferred_element_type=jnp.float32) + b_ref[...]
        return _gelu(z, approximate_gelu).astype(jnp.bfloat16)

    h = x_ref[...].astype(jnp.bfloat16)   # f32 HBM tile -> bf16 MXU operand
    h = layer(h, w1_ref, b1_ref)          # 784 -> 256
    h = layer(h, w2_ref, b2_ref)          # 256 -> 128
    h = layer(h, w3_ref, b3_ref)          # 128 -> 64
    h = layer(h, w4_ref, b4_ref)          # 64  -> 32
    out = jnp.dot(h, w5_ref[...], preferred_element_type=jnp.float32) + b5_ref[...]
    o_ref[...] = out.astype(o_ref.dtype)  # (block_rows, 1) masked store - tiny


@functools.partial(jax.jit, static_argnames=("block_rows", "approximate_gelu"))
def linear_discriminator_fwd(x, params, block_rows=2048, approximate_gelu=True):
    """x: (N, i_dim) f32.  params: list of 5 (w_T (in,out) f32, b (1,out) f32)."""
    n, i_dim = x.shape
    assert len(params) == 5

    # ---- static row-tile choice (shapes are Python ints at trace time) ----
    req = int(block_rows)
    if n >= 2 * 128:
        # Aim for at least 2 row blocks so both v7x TensorCores get work.
        req = min(req, _round_up(pl.cdiv(n, 2), 128))
    block_rows = max(8, min(req, _round_up(n, 8)))
    block_rows = _round_up(block_rows, 8)        # sublane multiple
    grid = (pl.cdiv(n, block_rows),)             # partial last block is clipped

    # ---- operand prep: only the (tiny) weights get a bf16 cast ----
    flat = []
    in_specs = [pl.BlockSpec((block_rows, i_dim), lambda i: (i, 0))]
    for w_t, b in params:
        w_bf16 = w_t.astype(jnp.bfloat16)        # MXU operand
        b_f32 = b.astype(jnp.float32)            # f32 epilogue bias
        flat.extend([w_bf16, b_f32])
        # Constant index_map: Pallas DMAs each weight/bias once and keeps it
        # resident across grid steps (total bf16 weights ~0.5 MiB).
        in_specs.append(pl.BlockSpec(w_bf16.shape, lambda i: (0, 0)))
        in_specs.append(pl.BlockSpec(b_f32.shape, lambda i: (0, 0)))

    out_spec = pl.BlockSpec((block_rows, 1), lambda i: (i, 0))

    # Advisory cost hint so XLA overlaps the producer of x with this call.
    flops = 2 * n * sum(w.shape[0] * w.shape[1] for w, _ in params)
    transcendentals = n * sum(w.shape[1] for w, _ in params[:-1])
    bytes_accessed = (n * (i_dim * 4 + 4)
                      + sum(w.shape[0] * w.shape[1] * 2 + b.shape[1] * 4
                            for w, b in params))

    out = pl.pallas_call(
        functools.partial(_mlp_kernel, approximate_gelu=approximate_gelu),
        out_shape=jax.ShapeDtypeStruct((n, 1), jnp.float32),
        grid_spec=pltpu.PrefetchScalarGridSpec(
            num_scalar_prefetch=0,
            grid=grid,
            in_specs=in_specs,
            out_specs=out_spec,
        ),
        compiler_params=pltpu.CompilerParams(
            dimension_semantics=("parallel",),     # shard row tiles across TCs
            vmem_limit_bytes=48 * 1024 * 1024,     # safe on v5e/v6e/v7x @ 2048 rows
        ),
        cost_estimate=pl.CostEstimate(
            flops=flops,
            transcendentals=transcendentals,
            bytes_accessed=bytes_accessed,
        ),
    )(x, *flat)

    return out


def init_params(key, i_dim=784, h_dim=32):
    """Synthetic init mimicking torch.nn.Linear default
    (uniform(-1/sqrt(fan_in), 1/sqrt(fan_in))); weights stored as W.T."""
    dims = [i_dim, h_dim * 8, h_dim * 4, h_dim * 2, h_dim, 1]
    params = []
    for idx in range(len(dims) - 1):
        fan_in, fan_out = dims[idx], dims[idx + 1]
        key, kw, kb = jax.random.split(key, 3)
        bound = 1.0 / math.sqrt(fan_in)
        w_t = jax.random.uniform(kw, (fan_in, fan_out), jnp.float32,
                                 minval=-bound, maxval=bound)
        b = jax.random.uniform(kb, (1, fan_out), jnp.float32,
                               minval=-bound, maxval=bound)
        params.append((w_t, b))
    return params


def reference_fwd(x, params, compute_dtype=jnp.float32, approximate_gelu=True):
    """Pure-JAX reference; compute_dtype=bfloat16 mirrors the kernel's casts."""
    h = x.astype(compute_dtype)
    for idx, (w_t, b) in enumerate(params):
        z = jnp.dot(h, w_t.astype(compute_dtype),
                    preferred_element_type=jnp.float32) + b
        if idx < len(params) - 1:
            h = jax.nn.gelu(z, approximate=approximate_gelu).astype(compute_dtype)
        else:
            h = z
    return h


if __name__ == "__main__":
    key = jax.random.PRNGKey(0)
    k_x, k_p = jax.random.split(key)

    batch, i_dim, h_dim = 8, 784, 32
    x = jax.random.normal(k_x, (batch, i_dim), dtype=jnp.float32)
    params = init_params(k_p, i_dim=i_dim, h_dim=h_dim)

    out = linear_discriminator_fwd(x, params)   # block_rows auto-clamps to 8
    out = jax.block_until_ready(out)
    assert out.shape == (batch, 1), out.shape
    assert bool(jnp.all(jnp.isfinite(out)))

    # Matched reference: same bf16 casts + tanh GELU as the kernel.
    ref_matched = reference_fwd(x, params, compute_dtype=jnp.bfloat16,
                                approximate_gelu=True)
    # Fidelity check vs the exact (erf) f32 torch-equivalent forward.
    ref_exact_f32 = reference_fwd(x, params, compute_dtype=jnp.float32,
                                  approximate_gelu=False)
    err_matched = float(jnp.max(jnp.abs(out - ref_matched)))
    err_exact = float(jnp.max(jnp.abs(out - ref_exact_f32)))
    assert err_matched < 2e-3, f"matched-reference max abs err = {err_matched}"
    assert err_exact < 3e-2, f"exact-f32 reference max abs err = {err_exact}"

    print("KERNEL_OK")
</pallas_src>

<mosaic_0001>
module attributes {stable_mosaic.version = 11 : i64} {
  func.func @_mlp_kernel(%arg0: i32, %arg1: memref<8x784xf32, #tpu.memory_space<vmem>>, %arg2: memref<784x256xbf16, #tpu.memory_space<vmem>>, %arg3: memref<1x256xf32, #tpu.memory_space<vmem>>, %arg4: memref<256x128xbf16, #tpu.memory_space<vmem>>, %arg5: memref<1x128xf32, #tpu.memory_space<vmem>>, %arg6: memref<128x64xbf16, #tpu.memory_space<vmem>>, %arg7: memref<1x64xf32, #tpu.memory_space<vmem>>, %arg8: memref<64x32xbf16, #tpu.memory_space<vmem>>, %arg9: memref<1x32xf32, #tpu.memory_space<vmem>>, %arg10: memref<32x1xbf16, #tpu.memory_space<vmem>>, %arg11: memref<1x1xf32, #tpu.memory_space<vmem>>, %arg12: memref<8x1xf32, #tpu.memory_space<vmem>>) attributes {dimension_semantics = [#tpu.dimension_semantics<parallel>], iteration_bounds = array<i64: 1>, scalar_prefetch = 0 : i64, scratch_operands = 0 : i64, tpu.core_type = #tpu.core_type<tc>, window_params = [{transform_indices = @transform_0, window_bounds = array<i64: 8, 784>}, {pipeline_mode = #tpu.pipeline_mode<synchronous>, transform_indices = @transform_1, window_bounds = array<i64: 784, 256>}, {pipeline_mode = #tpu.pipeline_mode<synchronous>, transform_indices = @transform_2, window_bounds = array<i64: 1, 256>}, {pipeline_mode = #tpu.pipeline_mode<synchronous>, transform_indices = @transform_3, window_bounds = array<i64: 256, 128>}, {pipeline_mode = #tpu.pipeline_mode<synchronous>, transform_indices = @transform_4, window_bounds = array<i64: 1, 128>}, {pipeline_mode = #tpu.pipeline_mode<synchronous>, transform_indices = @transform_5, window_bounds = array<i64: 128, 64>}, {pipeline_mode = #tpu.pipeline_mode<synchronous>, transform_indices = @transform_6, window_bounds = array<i64: 1, 64>}, {pipeline_mode = #tpu.pipeline_mode<synchronous>, transform_indices = @transform_7, window_bounds = array<i64: 64, 32>}, {pipeline_mode = #tpu.pipeline_mode<synchronous>, transform_indices = @transform_8, window_bounds = array<i64: 1, 32>}, {pipeline_mode = #tpu.pipeline_mode<synchronous>, transform_indices = @transform_9, window_bounds = array<i64: 32, 1>}, {pipeline_mode = #tpu.pipeline_mode<synchronous>, transform_indices = @transform_10, window_bounds = array<i64: 1, 1>}, {transform_indices = @transform_11, window_bounds = array<i64: 8, 1>}]} {
    %c0 = arith.constant 0 : index
    %c0_0 = arith.constant 0 : index
    %0 = vector.load %arg1[%c0, %c0_0] : memref<8x784xf32, #tpu.memory_space<vmem>>, vector<8x784xf32>
    %1 = arith.truncf %0 : vector<8x784xf32> to vector<8x784xbf16>
    %c0_1 = arith.constant 0 : index
    %c0_2 = arith.constant 0 : index
    %2 = vector.load %arg2[%c0_1, %c0_2] : memref<784x256xbf16, #tpu.memory_space<vmem>>, vector<784x256xbf16>
    %cst = arith.constant dense<0.000000e+00> : vector<8x256xf32>
    %3 = tpu.matmul %1, %2, %cst {dimension_numbers = #tpu.dot_dimension_numbers<[1], [0], [0], [1], [0, 0, 1, 1], [], []>} : vector<8x784xbf16>, vector<784x256xbf16>, vector<8x256xf32> -> vector<8x256xf32>
    %c0_3 = arith.constant 0 : index
    %c0_4 = arith.constant 0 : index
    %4 = vector.load %arg3[%c0_3, %c0_4] : memref<1x256xf32, #tpu.memory_space<vmem>>, vector<1x256xf32>
    %5 = vector.broadcast %4 : vector<1x256xf32> to vector<8x256xf32>
    %6 = arith.addf %3, %5 : vector<8x256xf32>
    %cst_5 = arith.constant 5.000000e-01 : f32
    %7 = vector.broadcast %cst_5 : f32 to vector<8x256xf32>
    %8 = arith.mulf %7, %6 : vector<8x256xf32>
    %9 = arith.mulf %6, %6 : vector<8x256xf32>
    %10 = arith.mulf %9, %6 : vector<8x256xf32>
    %cst_6 = arith.constant 4.471500e-02 : f32
    %11 = vector.broadcast %cst_6 : f32 to vector<8x256xf32>
    %12 = arith.mulf %11, %10 : vector<8x256xf32>
    %13 = arith.addf %6, %12 : vector<8x256xf32>
    %cst_7 = arith.constant 0.797884583 : f32
    %14 = vector.broadcast %cst_7 : f32 to vector<8x256xf32>
    %15 = arith.mulf %14, %13 : vector<8x256xf32>
    %16 = math.tanh %15 : vector<8x256xf32>
    %cst_8 = arith.constant 1.000000e+00 : f32
    %17 = vector.broadcast %cst_8 : f32 to vector<8x256xf32>
    %18 = arith.addf %17, %16 : vector<8x256xf32>
    %19 = arith.mulf %8, %18 : vector<8x256xf32>
    %20 = arith.truncf %19 : vector<8x256xf32> to vector<8x256xbf16>
    %c0_9 = arith.constant 0 : index
    %c0_10 = arith.constant 0 : index
    %21 = vector.load %arg4[%c0_9, %c0_10] : memref<256x128xbf16, #tpu.memory_space<vmem>>, vector<256x128xbf16>
    %cst_11 = arith.constant dense<0.000000e+00> : vector<8x128xf32>
    %22 = tpu.matmul %20, %21, %cst_11 {dimension_numbers = #tpu.dot_dimension_numbers<[1], [0], [0], [1], [0, 0, 1, 1], [], []>} : vector<8x256xbf16>, vector<256x128xbf16>, vector<8x128xf32> -> vector<8x128xf32>
    %c0_12 = arith.constant 0 : index
    %c0_13 = arith.constant 0 : index
    %23 = vector.load %arg5[%c0_12, %c0_13] : memref<1x128xf32, #tpu.memory_space<vmem>>, vector<1x128xf32>
    %24 = vector.broadcast %23 : vector<1x128xf32> to vector<8x128xf32>
    %25 = arith.addf %22, %24 : vector<8x128xf32>
    %cst_14 = arith.constant 5.000000e-01 : f32
    %26 = vector.broadcast %cst_14 : f32 to vector<8x128xf32>
    %27 = arith.mulf %26, %25 : vector<8x128xf32>
    %28 = arith.mulf %25, %25 : vector<8x128xf32>
    %29 = arith.mulf %28, %25 : vector<8x128xf32>
    %cst_15 = arith.constant 4.471500e-02 : f32
    %30 = vector.broadcast %cst_15 : f32 to vector<8x128xf32>
    %31 = arith.mulf %30, %29 : vector<8x128xf32>
    %32 = arith.addf %25, %31 : vector<8x128xf32>
    %cst_16 = arith.constant 0.797884583 : f32
    %33 = vector.broadcast %cst_16 : f32 to vector<8x128xf32>
    %34 = arith.mulf %33, %32 : vector<8x128xf32>
    %35 = math.tanh %34 : vector<8x128xf32>
    %cst_17 = arith.constant 1.000000e+00 : f32
    %36 = vector.broadcast %cst_17 : f32 to vector<8x128xf32>
    %37 = arith.addf %36, %35 : vector<8x128xf32>
    %38 = arith.mulf %27, %37 : vector<8x128xf32>
    %39 = arith.truncf %38 : vector<8x128xf32> to vector<8x128xbf16>
    %c0_18 = arith.constant 0 : index
    %c0_19 = arith.constant 0 : index
    %40 = vector.load %arg6[%c0_18, %c0_19] : memref<128x64xbf16, #tpu.memory_space<vmem>>, vector<128x64xbf16>
    %cst_20 = arith.constant dense<0.000000e+00> : vector<8x64xf32>
    %41 = tpu.matmul %39, %40, %cst_20 {dimension_numbers = #tpu.dot_dimension_numbers<[1], [0], [0], [1], [0, 0, 1, 1], [], []>} : vector<8x128xbf16>, vector<128x64xbf16>, vector<8x64xf32> -> vector<8x64xf32>
    %c0_21 = arith.constant 0 : index
    %c0_22 = arith.constant 0 : index
    %42 = vector.load %arg7[%c0_21, %c0_22] : memref<1x64xf32, #tpu.memory_space<vmem>>, vector<1x64xf32>
    %43 = vector.broadcast %42 : vector<1x64xf32> to vector<8x64xf32>
    %44 = arith.addf %41, %43 : vector<8x64xf32>
    %cst_23 = arith.constant 5.000000e-01 : f32
    %45 = vector.broadcast %cst_23 : f32 to vector<8x64xf32>
    %46 = arith.mulf %45, %44 : vector<8x64xf32>
    %47 = arith.mulf %44, %44 : vector<8x64xf32>
    %48 = arith.mulf %47, %44 : vector<8x64xf32>
    %cst_24 = arith.constant 4.471500e-02 : f32
    %49 = vector.broadcast %cst_24 : f32 to vector<8x64xf32>
    %50 = arith.mulf %49, %48 : vector<8x64xf32>
    %51 = arith.addf %44, %50 : vector<8x64xf32>
    %cst_25 = arith.constant 0.797884583 : f32
    %52 = vector.broadcast %cst_25 : f32 to vector<8x64xf32>
    %53 = arith.mulf %52, %51 : vector<8x64xf32>
    %54 = math.tanh %53 : vector<8x64xf32>
    %cst_26 = arith.constant 1.000000e+00 : f32
    %55 = vector.broadcast %cst_26 : f32 to vector<8x64xf32>
    %56 = arith.addf %55, %54 : vector<8x64xf32>
    %57 = arith.mulf %46, %56 : vector<8x64xf32>
    %58 = arith.truncf %57 : vector<8x64xf32> to vector<8x64xbf16>
    %c0_27 = arith.constant 0 : index
    %c0_28 = arith.constant 0 : index
    %59 = vector.load %arg8[%c0_27, %c0_28] : memref<64x32xbf16, #tpu.memory_space<vmem>>, vector<64x32xbf16>
    %cst_29 = arith.constant dense<0.000000e+00> : vector<8x32xf32>
    %60 = tpu.matmul %58, %59, %cst_29 {dimension_numbers = #tpu.dot_dimension_numbers<[1], [0], [0], [1], [0, 0, 1, 1], [], []>} : vector<8x64xbf16>, vector<64x32xbf16>, vector<8x32xf32> -> vector<8x32xf32>
    %c0_30 = arith.constant 0 : index
    %c0_31 = arith.constant 0 : index
    %61 = vector.load %arg9[%c0_30, %c0_31] : memref<1x32xf32, #tpu.memory_space<vmem>>, vector<1x32xf32>
    %62 = vector.broadcast %61 : vector<1x32xf32> to vector<8x32xf32>
    %63 = arith.addf %60, %62 : vector<8x32xf32>
    %cst_32 = arith.constant 5.000000e-01 : f32
    %64 = vector.broadcast %cst_32 : f32 to vector<8x32xf32>
    %65 = arith.mulf %64, %63 : vector<8x32xf32>
    %66 = arith.mulf %63, %63 : vector<8x32xf32>
    %67 = arith.mulf %66, %63 : vector<8x32xf32>
    %cst_33 = arith.constant 4.471500e-02 : f32
    %68 = vector.broadcast %cst_33 : f32 to vector<8x32xf32>
    %69 = arith.mulf %68, %67 : vector<8x32xf32>
    %70 = arith.addf %63, %69 : vector<8x32xf32>
    %cst_34 = arith.constant 0.797884583 : f32
    %71 = vector.broadcast %cst_34 : f32 to vector<8x32xf32>
    %72 = arith.mulf %71, %70 : vector<8x32xf32>
    %73 = math.tanh %72 : vector<8x32xf32>
    %cst_35 = arith.constant 1.000000e+00 : f32
    %74 = vector.broadcast %cst_35 : f32 to vector<8x32xf32>
    %75 = arith.addf %74, %73 : vector<8x32xf32>
    %76 = arith.mulf %65, %75 : vector<8x32xf32>
    %77 = arith.truncf %76 : vector<8x32xf32> to vector<8x32xbf16>
    %c0_36 = arith.constant 0 : index
    %c0_37 = arith.constant 0 : index
    %78 = vector.load %arg10[%c0_36, %c0_37] : memref<32x1xbf16, #tpu.memory_space<vmem>>, vector<32x1xbf16>
    %cst_38 = arith.constant dense<0.000000e+00> : vector<8x1xf32>
    %79 = tpu.matmul %77, %78, %cst_38 {dimension_numbers = #tpu.dot_dimension_numbers<[1], [0], [0], [1], [0, 0, 1, 1], [], []>} : vector<8x32xbf16>, vector<32x1xbf16>, vector<8x1xf32> -> vector<8x1xf32>
    %c0_39 = arith.constant 0 : index
    %c0_40 = arith.constant 0 : index
    %80 = vector.load %arg11[%c0_39, %c0_40] : memref<1x1xf32, #tpu.memory_space<vmem>>, vector<1x1xf32>
    %81 = vector.broadcast %80 : vector<1x1xf32> to vector<8x1xf32>
    %82 = arith.addf %79, %81 : vector<8x1xf32>
    %c0_41 = arith.constant 0 : index
    %c0_42 = arith.constant 0 : index
    %83 = vector.load %arg12[%c0_41, %c0_42] : memref<8x1xf32, #tpu.memory_space<vmem>>, vector<8x1xf32>
    tpu.vector_store %arg12[%c0_41, %c0_42], %82 {strides = array<i32>} : memref<8x1xf32, #tpu.memory_space<vmem>>, vector<8x1xf32>,
    return
  }
  func.func @transform_0(%arg0: i32) -> (i32, i32) {
    %c0_i32 = arith.constant 0 : i32
    %c0_i32_0 = arith.constant 0 : i32
    return %arg0, %c0_i32 : i32, i32
  }
  func.func @transform_1(%arg0: i32) -> (i32, i32) {
    %c0_i32 = arith.constant 0 : i32
    %c0_i32_0 = arith.constant 0 : i32
    %c0_i32_1 = arith.constant 0 : i32
    return %c0_i32, %c0_i32_0 : i32, i32
  }
  func.func @transform_2(%arg0: i32) -> (i32, i32) {
    %c0_i32 = arith.constant 0 : i32
    %c0_i32_0 = arith.constant 0 : i32
    %c0_i32_1 = arith.constant 0 : i32
    return %c0_i32, %c0_i32_0 : i32, i32
  }
  func.func @transform_3(%arg0: i32) -> (i32, i32) {
    %c0_i32 = arith.constant 0 : i32
    %c0_i32_0 = arith.constant 0 : i32
    %c0_i32_1 = arith.constant 0 : i32
    return %c0_i32, %c0_i32_0 : i32, i32
  }
  func.func @transform_4(%arg0: i32) -> (i32, i32) {
    %c0_i32 = arith.constant 0 : i32
    %c0_i32_0 = arith.constant 0 : i32
    %c0_i32_1 = arith.constant 0 : i32
    return %c0_i32, %c0_i32_0 : i32, i32
  }
  func.func @transform_5(%arg0: i32) -> (i32, i32) {
    %c0_i32 = arith.constant 0 : i32
    %c0_i32_0 = arith.constant 0 : i32
    %c0_i32_1 = arith.constant 0 : i32
    return %c0_i32, %c0_i32_0 : i32, i32
  }
  func.func @transform_6(%arg0: i32) -> (i32, i32) {
    %c0_i32 = arith.constant 0 : i32
    %c0_i32_0 = arith.constant 0 : i32
    %c0_i32_1 = arith.constant 0 : i32
    return %c0_i32, %c0_i32_0 : i32, i32
  }
  func.func @transform_7(%arg0: i32) -> (i32, i32) {
    %c0_i32 = arith.constant 0 : i32
    %c0_i32_0 = arith.constant 0 : i32
    %c0_i32_1 = arith.constant 0 : i32
    return %c0_i32, %c0_i32_0 : i32, i32
  }
  func.func @transform_8(%arg0: i32) -> (i32, i32) {
    %c0_i32 = arith.constant 0 : i32
    %c0_i32_0 = arith.constant 0 : i32
    %c0_i32_1 = arith.constant 0 : i32
    return %c0_i32, %c0_i32_0 : i32, i32
  }
  func.func @transform_9(%arg0: i32) -> (i32, i32) {
    %c0_i32 = arith.constant 0 : i32
    %c0_i32_0 = arith.constant 0 : i32
    %c0_i32_1 = arith.constant 0 : i32
    return %c0_i32, %c0_i32_0 : i32, i32
  }
  func.func @transform_10(%arg0: i32) -> (i32, i32) {
    %c0_i32 = arith.constant 0 : i32
    %c0_i32_0 = arith.constant 0 : i32
    %c0_i32_1 = arith.constant 0 : i32
    return %c0_i32, %c0_i32_0 : i32, i32
  }
  func.func @transform_11(%arg0: i32) -> (i32, i32) {
    %c0_i32 = arith.constant 0 : i32
    %c0_i32_0 = arith.constant 0 : i32
    return %arg0, %c0_i32 : i32, i32
  }
}

</mosaic_0001>

<bundles_post_ra>
// kernel: linear_discriminator_fwd.1
= control target key start
LH: loop header
LB: loop body
LE: loop exit
PB: predicated region body
PF: predicated region fallthrough
CT: control target
= control target key end

     0   :  { %vm655_vm0 = vcmask 130048   ;;  %vm1721_vm1 = vmmov 0   ;;  %vm1188_vm2 = vcmask 523264   ;;  %vm1265_vm3 = vcmask 261120   ;;  %s2225_s1 = inlined_call_operand.vmem [shape: bf16[784,256], index: 1, kind: input, shape index: {}]   ;;  %s2226_s0 = inlined_call_operand.vmem [shape: f32[8,784], index: 0, kind: input, shape index: {}]   ;;  %s2227_s3 = inlined_call_operand.vmem [shape: bf16[256,128], index: 3, kind: input, shape index: {}]   ;;  %s2228_s2 = inlined_call_operand.vmem [shape: f32[1,256], index: 2, kind: input, shape index: {}]   ;;  %s2229_s5 = inlined_call_operand.vmem [shape: bf16[128,64], index: 5, kind: input, shape index: {}]   ;;  %s2230_s4 = inlined_call_operand.vmem [shape: f32[1,128], index: 4, kind: input, shape index: {}]   ;;  %s2231_s7 = inlined_call_operand.vmem [shape: bf16[64,32], index: 7, kind: input, shape index: {}]   ;;  %s2232_s6 = inlined_call_operand.vmem [shape: f32[1,64], index: 6, kind: input, shape index: {}]   ;;  %s2233_s9 = inlined_call_operand.vmem [shape: bf16[32,1], index: 9, kind: input, shape index: {}]   ;;  %s2234_s10 = inlined_call_operand.<no memory space> [shape: f32[1,1], index: 10, kind: input, shape index: {}]   ;;  %s2235_s8 = inlined_call_operand.vmem [shape: f32[1,32], index: 8, kind: input, shape index: {}]   ;;  %s2236_s11 = inlined_call_operand.vmem [shape: f32[8,1], index: 11, kind: output, shape index: {}]  }
   0x1   :  { %v1532_v0 = vld [vmem:[%s2225_s1 + $0x74] ss:$8 sps:$4 sm:$0xff]   ;;  %v1534_v1 = vld [vmem:[%s2225_s1 + $0x70] ss:$8 sps:$4 sm:$0xff]   ;;  %v1538_v4 = vld [vmem:[%s2225_s1 + $0x64] ss:$8 sps:$4 sm:$0xff]  }
   0x2   :  { %659 = vmatprep.subr.bf16.mxu0 %v1532_v0  ;;  %v1535_v2 = vld [vmem:[%s2225_s1 + $0x174] ss:$8 sps:$4 sm:$0xff]   ;;  %v1537_v3 = vld [vmem:[%s2225_s1 + $0x170] ss:$8 sps:$4 sm:$0xff]   ;;  %v1540_v5 = vld [vmem:[%s2225_s1 + $0x60] ss:$8 sps:$4 sm:$0xff]  }
   0x3   :  { %660 = vmatpush1.bf16.msra.mxu0 %v1534_v1  ;;  %700 = vmatprep.subr.bf16.mxu1 %v1535_v2  ;;  %v1541_v6 = vld [vmem:[%s2225_s1 + $0x164] ss:$8 sps:$4 sm:$0xff]   ;;  %v1543_v7 = vld [vmem:[%s2225_s1 + $0x160] ss:$8 sps:$4 sm:$0xff]   ;;  %v1544_v8 = vld [vmem:[%s2225_s1 + $0x54] ss:$8 sps:$4 sm:$0xff]  }
   0x4   :  { %701 = vmatpush1.bf16.msra.mxu1 %v1537_v3  ;;  %661 = vmatprep.subr.bf16.mxu0 %v1538_v4  ;;  %v1546_v9 = vld [vmem:[%s2225_s1 + $0x50] ss:$8 sps:$4 sm:$0xff]   ;;  %v1547_v10 = vld [vmem:[%s2225_s1 + $0x154] ss:$8 sps:$4 sm:$0xff]   ;;  %v1550_v11 = vld [vmem:[%s2225_s1 + $0x44] ss:$8 sps:$4 sm:$0xff]  }
   0x5   :  { %702 = vmatprep.subr.bf16.mxu1 %v1541_v6  ;;  %v1549_v12 = vld [vmem:[%s2225_s1 + $0x150] ss:$8 sps:$4 sm:$0xff]   ;;  %v1553_v13 = vld [vmem:[%s2225_s1 + $0x144] ss:$8 sps:$4 sm:$0xff]   ;;  %v1552_v14 = vld [vmem:[%s2225_s1 + $0x40] ss:$8 sps:$4 sm:$0xff]  }
   0x6   :  { %v1556_v15 = vld [vmem:[%s2225_s1 + $0x34] ss:$8 sps:$4 sm:$0xff]   ;;  %v1555_v16 = vld [vmem:[%s2225_s1 + $0x140] ss:$8 sps:$4 sm:$0xff]   ;;  %v1558_v18 = vld [vmem:[%s2225_s1 + $0x30] ss:$8 sps:$4 sm:$0xff]  }
   0x7   :  { %662 = vmatpush1.bf16.msra.mxu0 %v1540_v5  ;;  %v1559_v17 = vld [vmem:[%s2225_s1 + $0x134] ss:$8 sps:$4 sm:$0xff]   ;;  %v1562_v19 = vld [vmem:[%s2225_s1 + $0x24] ss:$8 sps:$4 sm:$0xff]   ;;  %v1561_v20 = vld [vmem:[%s2225_s1 + $0x130] ss:$8 sps:$4 sm:$0xff]  }
   0x8   :  { %663 = vmatprep.subr.bf16.mxu0 %v1544_v8  ;;  %703 = vmatpush1.bf16.msra.mxu1 %v1543_v7  ;;  %v1565_v21 = vld [vmem:[%s2225_s1 + $0x124] ss:$8 sps:$4 sm:$0xff]   ;;  %v1564_v22 = vld [vmem:[%s2225_s1 + $0x20] ss:$8 sps:$4 sm:$0xff]   ;;  %v1568_v23 = vld [vmem:[%s2225_s1 + $0x14] ss:$8 sps:$4 sm:$0xff]  }
   0x9   :  { %704 = vmatprep.subr.bf16.mxu1 %v1547_v10  ;;  %v1567_v24 = vld [vmem:[%s2225_s1 + $0x120] ss:$8 sps:$4 sm:$0xff]   ;;  %v1571_v25 = vld [vmem:[%s2225_s1 + $0x114] ss:$8 sps:$4 sm:$0xff]   ;;  %v1570_v26 = vld [vmem:[%s2225_s1 + $0x10] ss:$8 sps:$4 sm:$0xff]  }
   0xa   :  { %v1574_v27 = vld [vmem:[%s2225_s1 + $0x4] ss:$8 sps:$4 sm:$0xff]   ;;  %v1573_v28 = vld [vmem:[%s2225_s1 + $0x110] ss:$8 sps:$4 sm:$0xff]   ;;  %v1576_v30 = vld [vmem:[%s2225_s1] ss:$8 sps:$4 sm:$0xff]  }
   0xb   :  { %664 = vmatpush1.bf16.msra.mxu0 %v1546_v9  ;;  %v1577_v29 = vld [vmem:[%s2225_s1 + $0x104] ss:$8 sps:$4 sm:$0xff]   ;;  %v1580_v31 = vld [vmem:[%s2225_s1 + $0xf4] ss:$8 sps:$4 sm:$0xff]   ;;  %v1579_v32 = vld [vmem:[%s2225_s1 + $0x100] ss:$8 sps:$4 sm:$0xff]  }
   0xc   :  { %665 = vmatprep.subr.bf16.mxu0 %v1550_v11  ;;  %705 = vmatpush1.bf16.msra.mxu1 %v1549_v12  ;;  %v1583_v33 = vld [vmem:[%s2225_s1 + $0x1f4] ss:$8 sps:$4 sm:$0xff]   ;;  %v1582_v34 = vld [vmem:[%s2225_s1 + $0xf0] ss:$8 sps:$4 sm:$0xff]   ;;  %v1586_v35 = vld [vmem:[%s2225_s1 + $0xe4] ss:$8 sps:$4 sm:$0xff]  }
   0xd   :  { %706 = vmatprep.subr.bf16.mxu1 %v1553_v13  ;;  %v1585_v36 = vld [vmem:[%s2225_s1 + $0x1f0] ss:$8 sps:$4 sm:$0xff]   ;;  %v1589_v37 = vld [vmem:[%s2225_s1 + $0x1e4] ss:$8 sps:$4 sm:$0xff]   ;;  %v1588_v38 = vld [vmem:[%s2225_s1 + $0xe0] ss:$8 sps:$4 sm:$0xff]  }
   0xe   :  { %v1592_v39 = vld [vmem:[%s2225_s1 + $0xd4] ss:$8 sps:$4 sm:$0xff]   ;;  %v1591_v40 = vld [vmem:[%s2225_s1 + $0x1e0] ss:$8 sps:$4 sm:$0xff]   ;;  %v1594_v42 = vld [vmem:[%s2225_s1 + $0xd0] ss:$8 sps:$4 sm:$0xff]  }
   0xf   :  { %666 = vmatpush1.bf16.msra.mxu0 %v1552_v14  ;;  %v1595_v41 = vld [vmem:[%s2225_s1 + $0x1d4] ss:$8 sps:$4 sm:$0xff]   ;;  %v1598_v43 = vld [vmem:[%s2225_s1 + $0xc4] ss:$8 sps:$4 sm:$0xff]   ;;  %v1597_v44 = vld [vmem:[%s2225_s1 + $0x1d0] ss:$8 sps:$4 sm:$0xff]  }
  0x10   :  { %667 = vmatprep.subr.bf16.mxu0 %v1556_v15  ;;  %707 = vmatpush1.bf16.msra.mxu1 %v1555_v16  ;;  %v1601_v45 = vld [vmem:[%s2225_s1 + $0x1c4] ss:$8 sps:$4 sm:$0xff]   ;;  %v1600_v47 = vld [vmem:[%s2225_s1 + $0xc0] ss:$8 sps:$4 sm:$0xff]   ;;  %v1604_v49 = vld [vmem:[%s2225_s1 + $0xb4] ss:$8 sps:$4 sm:$0xff]  }
  0x11   :  { %708 = vmatprep.subr.bf16.mxu1 %v1559_v17  ;;  %v42_v46 = vld [vmem:[%s2226_s0 + $0x8] sm:$0xff]  ;;  %v44_v50 = vld [vmem:[%s2226_s0 + $0x18] sm:$0xff]  ;;  %v41_v4 = vld [vmem:[%s2226_s0] sm:$0xff]  ;;  %v1719_v17 = vmov 0   ;;  %vm1309_vm4 = vcmask 7168  }
  0x12   :  { %v49_v48 = vpack.c.bf16 %v42_v46, %v42_v46  ;;  %v1603_v51 = vld [vmem:[%s2225_s1 + $0x1c0] ss:$8 sps:$4 sm:$0xff]   ;;  %v51_v52 = vpack.c.bf16 %v44_v50, %v44_v50  ;;  %v1607_v53 = vld [vmem:[%s2225_s1 + $0x1b4] ss:$8 sps:$4 sm:$0xff]   ;;  %v1606_v54 = vld [vmem:[%s2225_s1 + $0xb0] ss:$8 sps:$4 sm:$0xff]   ;;  %v48_v7 = vpack.c.bf16 %v41_v4, %v41_v4 }
  0x13   :  { %668 = vmatpush1.bf16.msra.mxu0 %v1558_v18  ;;  %v1610_v55 = vld [vmem:[%s2225_s1 + $0xa4] ss:$8 sps:$4 sm:$0xff]   ;;  %v1609_v56 = vld [vmem:[%s2225_s1 + $0x1b0] ss:$8 sps:$4 sm:$0xff]   ;;  %v1612_v58 = vld [vmem:[%s2225_s1 + $0xa0] ss:$8 sps:$4 sm:$0xff]  }
  0x14   :  { %669 = vmatprep.subr.bf16.mxu0 %v1562_v19  ;;  %709 = vmatpush1.bf16.msra.mxu1 %v1561_v20  ;;  %v1613_v57 = vld [vmem:[%s2225_s1 + $0x1a4] ss:$8 sps:$4 sm:$0xff]   ;;  %v1616_v59 = vld [vmem:[%s2225_s1 + $0x94] ss:$8 sps:$4 sm:$0xff]   ;;  %v1615_v60 = vld [vmem:[%s2225_s1 + $0x1a0] ss:$8 sps:$4 sm:$0xff]  }
  0x15   :  { %710 = vmatprep.subr.bf16.mxu1 %v1565_v21  ;;  %691 = vmatprep.mubr.bf16.mxu0 %v49_v48  ;;  %v1619_v61 = vld [vmem:[%s2225_s1 + $0x194] ss:$8 sps:$4 sm:$0xff]   ;;  %v1618_v62 = vld [vmem:[%s2225_s1 + $0x90] ss:$8 sps:$4 sm:$0xff]   ;;  %v1622_v63 = vld [vmem:[%s2225_s1 + $0x84] ss:$8 sps:$4 sm:$0xff]  }
  0x16   :  { %732 = vmatprep.mubr.bf16.mxu1 %v51_v52  ;;  %v1621_v0 = vld [vmem:[%s2225_s1 + $0x190] ss:$8 sps:$4 sm:$0xff]   ;;  %v1624_v1 = vld [vmem:[%s2225_s1 + $0x80] ss:$8 sps:$4 sm:$0xff]   ;;  %v1625_v2 = vld [vmem:[%s2225_s1 + $0x184] ss:$8 sps:$4 sm:$0xff]  }
  0x17   :  { %670 = vmatpush1.bf16.msra.mxu0 %v1564_v22  ;;  %v1627_v3 = vld [vmem:[%s2225_s1 + $0x180] ss:$8 sps:$4 sm:$0xff]   ;;  %v1630_v5 = vld [vmem:[%s2225_s1 + $0x274] ss:$8 sps:$4 sm:$0xff]   ;;  %v1628_v8 = vld [vmem:[%s2225_s1 + $0x270] ss:$8 sps:$4 sm:$0xff]  }
  0x18   :  { %671 = vmatprep.subr.bf16.mxu0 %v1568_v23  ;;  %711 = vmatpush1.bf16.msra.mxu1 %v1567_v24  ;;  %v43_v6 = vld [vmem:[%s2226_s0 + $0x10] sm:$0xff]  ;;  %v1633_v9 = vld [vmem:[%s2225_s1 + $0x264] ss:$8 sps:$4 sm:$0xff]   ;;  %v1673_v11 = vld [vmem:[%s2225_s1 + $0x300] ss:$8 sps:$4 sm:$0xff]  }
  0x19   :  { %712 = vmatprep.subr.bf16.mxu1 %v1571_v25  ;;  %v50_v10 = vpack.c.bf16 %v43_v6, %v43_v6  ;;  %v1675_v12 = vld [vmem:[%s2225_s1 + $0x304] ss:$8 sps:$4 sm:$0xff]   ;;  %v1631_v13 = vld [vmem:[%s2225_s1 + $0x260] ss:$8 sps:$4 sm:$0xff]   ;;  %v1636_v15 = vld [vmem:[%s2225_s1 + $0x254] ss:$8 sps:$4 sm:$0xff]  }
  0x1a   :  { %v46_v14 = vld [vmem:[%s2226_s0 + $0x28] sm:$0xff]  ;;  %v47_v18 = vld [vmem:[%s2226_s0 + $0x30] sm:$0xff]  ;;  %v1680_v50 = vld [vmem:[%s2227_s3 + $0x38] sm:$0xff]  }
  0x1b   :  { %672 = vmatpush1.bf16.msra.mxu0 %v1570_v26  ;;  %v53_v16 = vpack.c.bf16 %v46_v14, %v46_v14  ;;  %v1634_v19 = vld [vmem:[%s2225_s1 + $0x250] ss:$8 sps:$4 sm:$0xff]   ;;  %v1639_v20 = vld [vmem:[%s2225_s1 + $0x244] ss:$8 sps:$4 sm:$0xff]   ;;  %v54_v21 = vpack.c.bf16 %v47_v18, %v47_v18  ;;  %v1637_v22 = vld [vmem:[%s2225_s1 + $0x240] ss:$8 sps:$4 sm:$0xff]  }
  0x1c   :  { %673 = vmatprep.subr.bf16.mxu0 %v1574_v27  ;;  %713 = vmatpush1.bf16.msra.mxu1 %v1573_v28  ;;  %v1642_v23 = vld [vmem:[%s2225_s1 + $0x234] ss:$8 sps:$4 sm:$0xff]   ;;  %v1640_v24 = vld [vmem:[%s2225_s1 + $0x230] ss:$8 sps:$4 sm:$0xff]   ;;  %v1645_v25 = vld [vmem:[%s2225_s1 + $0x224] ss:$8 sps:$4 sm:$0xff]  }
  0x1d   :  { %714 = vmatprep.subr.bf16.mxu1 %v1577_v29  ;;  %v1643_v26 = vld [vmem:[%s2225_s1 + $0x220] ss:$8 sps:$4 sm:$0xff]   ;;  %v1648_v27 = vld [vmem:[%s2225_s1 + $0x214] ss:$8 sps:$4 sm:$0xff]   ;;  %v1646_v28 = vld [vmem:[%s2225_s1 + $0x210] ss:$8 sps:$4 sm:$0xff]  }
  0x1e   :  { %v1651_v29 = vld [vmem:[%s2225_s1 + $0x204] ss:$8 sps:$4 sm:$0xff]   ;;  %v1676_v46 = vld [vmem:[%s2225_s1 + $0x280] ss:$8 sps:$4 sm:$0xff]   ;;  %v1682_v52 = vld [vmem:[%s2227_s3 + $0x30] sm:$0xff]  }
  0x1f   :  { %674 = vmatpush1.bf16.msra.mxu0 %v1576_v30  ;;  %v1649_v30 = vld [vmem:[%s2225_s1 + $0x200] ss:$8 sps:$4 sm:$0xff]  }
  0x20   :  { %675 = vmatprep.subr.bf16.mxu0 %v1580_v31  ;;  %715 = vmatpush1.bf16.msra.mxu1 %v1579_v32  ;;  %v1654_v31 = vld [vmem:[%s2225_s1 + $0x2f4] ss:$8 sps:$4 sm:$0xff]   ;;  %v1652_v32 = vld [vmem:[%s2225_s1 + $0x2f0] ss:$8 sps:$4 sm:$0xff]  }
  0x21   :  { %716 = vmatprep.subr.bf16.mxu1 %v1583_v33  ;;  %v1657_v33 = vld [vmem:[%s2225_s1 + $0x2e4] ss:$8 sps:$4 sm:$0xff]  }
  0x23   :  { %676 = vmatpush2.bf16.msra.mxu0 %v1582_v34  ;;  %v1655_v34 = vld [vmem:[%s2225_s1 + $0x2e0] ss:$8 sps:$4 sm:$0xff]  }
  0x24   :  { %677 = vmatprep.subr.bf16.mxu0 %v1586_v35  ;;  %717 = vmatpush2.bf16.msra.mxu1 %v1585_v36  ;;  %v1660_v35 = vld [vmem:[%s2225_s1 + $0x2d4] ss:$8 sps:$4 sm:$0xff]   ;;  %v1658_v36 = vld [vmem:[%s2225_s1 + $0x2d0] ss:$8 sps:$4 sm:$0xff]  }
  0x25   :  { %718 = vmatprep.subr.bf16.mxu1 %v1589_v37  ;;  %v1663_v37 = vld [vmem:[%s2225_s1 + $0x2c4] ss:$8 sps:$4 sm:$0xff]  }
  0x27   :  { %678 = vmatpush2.bf16.msra.mxu0 %v1588_v38  ;;  %v1661_v38 = vld [vmem:[%s2225_s1 + $0x2c0] ss:$8 sps:$4 sm:$0xff]  }
  0x28   :  { %679 = vmatprep.subr.bf16.mxu0 %v1592_v39  ;;  %719 = vmatpush2.bf16.msra.mxu1 %v1591_v40  ;;  %v1666_v39 = vld [vmem:[%s2225_s1 + $0x2b4] ss:$8 sps:$4 sm:$0xff]   ;;  %v1664_v40 = vld [vmem:[%s2225_s1 + $0x2b0] ss:$8 sps:$4 sm:$0xff]  }
  0x29   :  { %720 = vmatprep.subr.bf16.mxu1 %v1595_v41  ;;  %v1669_v41 = vld [vmem:[%s2225_s1 + $0x2a4] ss:$8 sps:$4 sm:$0xff]  }
  0x2b   :  { %680 = vmatpush2.bf16.msra.mxu0 %v1594_v42  ;;  %v1667_v42 = vld [vmem:[%s2225_s1 + $0x2a0] ss:$8 sps:$4 sm:$0xff]  }
  0x2c   :  { %681 = vmatprep.subr.bf16.mxu0 %v1598_v43  ;;  %721 = vmatpush2.bf16.msra.mxu1 %v1597_v44  ;;  %v1672_v43 = vld [vmem:[%s2225_s1 + $0x294] ss:$8 sps:$4 sm:$0xff]   ;;  %v1670_v44 = vld [vmem:[%s2225_s1 + $0x290] ss:$8 sps:$4 sm:$0xff]  }
  0x2d   :  { %722 = vmatprep.subr.bf16.mxu1 %v1601_v45  ;;  %v1678_v45 = vld [vmem:[%s2225_s1 + $0x284] ss:$8 sps:$4 sm:$0xff]  }
  0x2f   :  { %682 = vmatpush2.bf16.msra.mxu0 %v1600_v47  ;;  %v45_v47 = vld [vmem:[%s2226_s0 + $0x20] sm:$0xff] }
  0x30   :  { %683 = vmatprep.subr.bf16.mxu0 %v1604_v49  ;;  %723 = vmatpush2.bf16.msra.mxu1 %v1603_v51  ;;  %v52_v48 = vpack.c.bf16 %v45_v47, %v45_v47  ;;  %v1679_v49 = vld [vmem:[%s2227_s3 + $0x78] sm:$0xff]   ;;  %v1681_v51 = vld [vmem:[%s2227_s3 + $0x70] sm:$0xff]  }
  0x31   :  { %724 = vmatprep.subr.bf16.mxu1 %v1607_v53  ;;  %v1683_v53 = vld [vmem:[%s2227_s3 + $0x68] sm:$0xff]  }
  0x33   :  { %684 = vmatpush2.bf16.msra.mxu0 %v1606_v54  ;;  %v1684_v54 = vld [vmem:[%s2227_s3 + $0x28] sm:$0xff]  }
  0x34   :  { %685 = vmatprep.subr.bf16.mxu0 %v1610_v55  ;;  %725 = vmatpush2.bf16.msra.mxu1 %v1609_v56  ;;  %v1685_v55 = vld [vmem:[%s2227_s3 + $0x60] sm:$0xff]  }
  0x35   :  { %726 = vmatprep.subr.bf16.mxu1 %v1613_v57  ;;  %v1686_v56 = vld [vmem:[%s2227_s3 + $0x20] sm:$0xff]   ;;  %v1687_v57 = vld [vmem:[%s2227_s3 + $0x58] sm:$0xff]  }
  0x37   :  { %686 = vmatpush2.bf16.msra.mxu0 %v1612_v58  ;;  %v1688_v58 = vld [vmem:[%s2227_s3 + $0x18] sm:$0xff]  }
  0x38   :  { %687 = vmatprep.subr.bf16.mxu0 %v1616_v59  ;;  %727 = vmatpush2.bf16.msra.mxu1 %v1615_v60  ;;  %v1689_v59 = vld [vmem:[%s2227_s3 + $0x50] sm:$0xff]  }
  0x39   :  { %728 = vmatprep.subr.bf16.mxu1 %v1619_v61  ;;  %v1690_v60 = vld [vmem:[%s2227_s3 + $0x10] sm:$0xff]   ;;  %v1691_v61 = vld [vmem:[%s2227_s3 + $0x48] sm:$0xff]  }
  0x3b   :  { %688 = vmatpush2.bf16.msra.mxu0 %v1618_v62  ;;  %v1692_v62 = vld [vmem:[%s2227_s3 + $0x8] sm:$0xff]  }
  0x3c   :  { %689 = vmatprep.subr.bf16.mxu0 %v1622_v63  ;;  %729 = vmatpush2.bf16.msra.mxu1 %v1621_v0  ;;  %v1693_v63 = vld [vmem:[%s2227_s3 + $0x40] sm:$0xff]  }
  0x3d   :  { %730 = vmatprep.subr.bf16.mxu1 %v1625_v2  ;;  %v1694_v0 = vld [vmem:[%s2227_s3] sm:$0xff]  }
  0x3f   :  { %690 = vmatpush2.bf16.msra.mxu0 %v1624_v1 }
  0x40   :  { %741 = vmatprep.subr.bf16.mxu0 %v1630_v5  ;;  %731 = vmatpush2.bf16.msra.mxu1 %v1627_v3 }
  0x41   :  { %796 = vmatprep.subr.bf16.mxu1 %v1675_v12 }
  0x42   :  { %692 = vmatmul.mubr.bf16.vlgmr.msra.gmra.mxu0 %v48_v7 }
  0x43   :  { %742 = vmatpush1.bf16.msra.mxu0 %v1628_v8  ;;  %733 = vmatmul.mubr.bf16.vlgmr.msra.gmra.mxu1 %v50_v10 }
  0x44   :  { %743 = vmatprep.subr.bf16.mxu0 %v1633_v9  ;;  %797 = vmatpush1.bf16.msra.mxu1 %v1673_v11 }
  0x45   :  { %814 = vmatprep.mubr.bf16.mxu1 %v1719_v17  ;;  %773 = vmatprep.mubr.bf16.mxu0 %v53_v16  ;;  %v153_v16 = vld [vmem:[%s2228_s2] sm:$0x3] }
  0x46   :  { %1450 = vmatprep.subr.bf16.mxu1 %v1679_v49 }
  0x47   :  { %744 = vmatpush1.bf16.msra.mxu0 %v1631_v13  ;;  %v155_v13 = vlaneseq }
  0x48   :  { %745 = vmatprep.subr.bf16.mxu0 %v1636_v15 }
  0x49   :  { %v156_v14 = vshrl.u32 %v155_v13, 7 }
  0x4b   :  { %746 = vmatpush1.bf16.msra.mxu0 %v1634_v19  ;;  %1413 = vmatmul.mubr.msk.bf16.vlgmr.msra.gmra.mxu1 %vm655_vm0, %v54_v21  ;;  %v157_v15 = vsub.s32 0, %v156_v14  ;;  %v161_v17 = vsub.s32 1, %v156_v14  ;;  %v1703_v14 = vld [vmem:[%s2231_s7 + $0x18] sm:$0xff]  }
  0x4c   :  { %747 = vmatprep.subr.bf16.mxu0 %v1639_v20  ;;  %1451 = vmatpush3.bf16.msra.mxu1 %v1680_v50 }
  0x4d   :  { %1452 = vmatprep.subr.bf16.mxu1 %v1681_v51  ;;  %v158_v18 = vrot.slane %v153_v16, %v157_v15  ;;  %v162_v19 = vrot.slane %v153_v16, %v161_v17  ;;  %v1704_v15 = vld [vmem:[%s2231_s7 + $0x10] sm:$0xff]   ;;  %v1705_v16 = vld [vmem:[%s2231_s7 + $0x8] sm:$0xff]   ;;  %v1706_v17 = vld [vmem:[%s2231_s7] sm:$0xff]  }
  0x4f   :  { %748 = vmatpush1.bf16.msra.mxu0 %v1637_v22 }
  0x50   :  { %749 = vmatprep.subr.bf16.mxu0 %v1642_v23  ;;  %1453 = vmatpush3.bf16.msra.mxu1 %v1682_v52  ;;  %v1695_v52 = vld [vmem:[%s2229_s5 + $0x38] sm:$0xff]  }
  0x51   :  { %1454 = vmatprep.subr.bf16.mxu1 %v1683_v53  ;;  %v1720_v53 = vmov 0.0  }
  0x53   :  { %750 = vmatpush1.bf16.msra.mxu0 %v1640_v24 }
  0x54   :  { %751 = vmatprep.subr.bf16.mxu0 %v1645_v25  ;;  %1455 = vmatpush3.bf16.msra.mxu1 %v1684_v54  ;;  %v1696_v54 = vld [vmem:[%s2229_s5 + $0x30] sm:$0xff]  }
  0x55   :  { %1456 = vmatprep.subr.bf16.mxu1 %v1685_v55  ;;  %v1697_v55 = vld [vmem:[%s2229_s5 + $0x28] sm:$0xff]  }
  0x57   :  { %752 = vmatpush1.bf16.msra.mxu0 %v1643_v26 }
  0x58   :  { %753 = vmatprep.subr.bf16.mxu0 %v1648_v27  ;;  %1457 = vmatpush3.bf16.msra.mxu1 %v1686_v56  ;;  %v1698_v56 = vld [vmem:[%s2229_s5 + $0x20] sm:$0xff]  }
  0x59   :  { %1458 = vmatprep.subr.bf16.mxu1 %v1687_v57  ;;  %v1699_v57 = vld [vmem:[%s2229_s5 + $0x18] sm:$0xff]  }
  0x5b   :  { %754 = vmatpush1.bf16.msra.mxu0 %v1646_v28 }
  0x5c   :  { %755 = vmatprep.subr.bf16.mxu0 %v1651_v29  ;;  %1459 = vmatpush3.bf16.msra.mxu1 %v1688_v58  ;;  %v1700_v58 = vld [vmem:[%s2229_s5 + $0x10] sm:$0xff]  }
  0x5d   :  { %1460 = vmatprep.subr.bf16.mxu1 %v1689_v59  ;;  %v1701_v59 = vld [vmem:[%s2229_s5 + $0x8] sm:$0xff]  }
  0x5f   :  { %756 = vmatpush1.bf16.msra.mxu0 %v1649_v30 }
  0x60   :  { %757 = vmatprep.subr.bf16.mxu0 %v1654_v31  ;;  %1461 = vmatpush3.bf16.msra.mxu1 %v1690_v60  ;;  %v1702_v60 = vld [vmem:[%s2229_s5] sm:$0xff]  }
  0x61   :  { %1462 = vmatprep.subr.bf16.mxu1 %v1691_v61 }
  0x63   :  { %758 = vmatpush2.bf16.msra.mxu0 %v1652_v32 }
  0x64   :  { %759 = vmatprep.subr.bf16.mxu0 %v1657_v33  ;;  %1463 = vmatpush3.bf16.msra.mxu1 %v1692_v62  ;;  %v1414_v62 = vld [vmem:[%s2230_s4] ss:$0 sm:$0xff] }
  0x65   :  { %1464 = vmatprep.subr.bf16.mxu1 %v1693_v63 }
  0x67   :  { %760 = vmatpush2.bf16.msra.mxu0 %v1655_v34 }
  0x68   :  { %761 = vmatprep.subr.bf16.mxu0 %v1660_v35  ;;  %1465 = vmatpush3.bf16.msra.mxu1 %v1694_v0 }
  0x69   :  { %1489 = vmatprep.subr.bf16.mxu1 %v1720_v53 }
  0x6b   :  { %762 = vmatpush2.bf16.msra.mxu0 %v1658_v36 }
  0x6c   :  { %763 = vmatprep.subr.bf16.mxu0 %v1663_v37 }
  0x6f   :  { %764 = vmatpush2.bf16.msra.mxu0 %v1661_v38 }
  0x70   :  { %765 = vmatprep.subr.bf16.mxu0 %v1666_v39 }
  0x73   :  { %766 = vmatpush2.bf16.msra.mxu0 %v1664_v40 }
  0x74   :  { %767 = vmatprep.subr.bf16.mxu0 %v1669_v41 }
  0x77   :  { %768 = vmatpush2.bf16.msra.mxu0 %v1667_v42 }
  0x78   :  { %769 = vmatprep.subr.bf16.mxu0 %v1672_v43 }
  0x7b   :  { %770 = vmatpush2.bf16.msra.mxu0 %v1670_v44 }
  0x7c   :  { %771 = vmatprep.subr.bf16.mxu0 %v1678_v45 }
  0x7f   :  { %772 = vmatpush2.bf16.msra.mxu0 %v1676_v46 }
  0x80   :  { %1509 = vmatprep.subr.bf16.mxu0 %v1720_v53 }
  0x82   :  { %774 = vmatmul.mubr.bf16.vlgmr.msra.gmra.mxu0 %v52_v48 }
  0x83   :  { %1517 = vmatprep.mubr.msk.bf16.mxu0 %vm1721_vm1, %v1720_v53  ;;  %1510 = vmatpush3.bf16.msra.mxu0 %v1703_v14 }
  0x84   :  { %1511 = vmatprep.subr.bf16.mxu0 %v1720_v53 }
  0x87   :  { %1512 = vmatpush3.bf16.msra.mxu0 %v1704_v15 }
  0x88   :  { %1513 = vmatprep.subr.bf16.mxu0 %v1720_v53 }
  0x8b   :  { %1514 = vmatpush3.bf16.msra.mxu0 %v1705_v16 }
  0x8c   :  { %1515 = vmatprep.subr.bf16.mxu0 %v1720_v53 }
  0x8f   :  { %1516 = vmatpush3.bf16.msra.mxu0 %v1706_v17 }
 0x102   :  { %v693_v1 = vpop.f32.mrf.mxu0 }
 0x103   :  { %v734_v3 = vpop.f32.mrf.mxu1  ;;  %v694_v20 = vadd.f32 %v693_v1, %v158_v18  ;;  %v1431_v18 = vld [vmem:[%s2232_s6] ss:$0 sm:$0xff] }
 0x104   :  { %v695_v2 = vpop.f32.mrf.mxu0 }
 0x105   :  { %v736_v5 = vpop.f32.mrf.mxu1  ;;  %v696_v21 = vadd.f32 %v695_v2, %v162_v19  ;;  %v735_v22 = vadd.f32 %v734_v3, %v694_v20 }
 0x106   :  { %v697_v4 = vpop.f32.mrf.mxu0 }
 0x107   :  { %v738_v7 = vpop.f32.mrf.mxu1  ;;  %v737_v24 = vadd.f32 %v736_v5, %v696_v21 }
 0x108   :  { %v698_v6 = vpop.f32.mrf.mxu0 }
 0x109   :  { %v739_v8 = vpop.f32.mrf.mxu1 }
 0x10b   :  { %v816_v9 = vpop.f32.mrf.mxu1 }
 0x10d   :  { %v818_v10 = vpop.f32.mrf.mxu1 }
 0x10f   :  { %v820_v11 = vpop.f32.mrf.mxu1 }
 0x111   :  { %v821_v12 = vpop.f32.mrf.mxu1 }
 0x142   :  { %v775_v23 = vpop.f32.mrf.mxu0 }
 0x143   :  { %v776_v25 = vadd.f32 %v775_v23, %v735_v22 }
 0x144   :  { %v777_v26 = vpop.f32.mrf.mxu0 }
 0x145   :  { %v817_v27 = vadd.f32 %v816_v9, %v776_v25  ;;  %v778_v28 = vadd.f32 %v777_v26, %v737_v24 }
 0x146   :  { %v779_v29 = vpop.f32.mrf.mxu0 }
 0x147   :  { %v825_v30 = vmul.f32 %v817_v27, %v817_v27  ;;  %v819_v31 = vadd.f32 %v818_v10, %v778_v28  ;;  %v823_v45 = vmul.f32 0.5, %v817_v27 }
 0x148   :  { %v780_v32 = vpop.f32.mrf.mxu0 }
 0x149   :  { %v827_v33 = vmul.f32 %v825_v30, %v817_v27  ;;  %v826_v34 = vmul.f32 %v819_v31, %v819_v31  ;;  %v824_v46 = vmul.f32 0.5, %v819_v31 }
 0x14b   :  { %v829_v35 = vmul.f32 0.044715, %v827_v33  ;;  %v828_v36 = vmul.f32 %v826_v34, %v819_v31  ;;  %v1707_v34 = vld [vmem:[%s2233_s9 + $0x8] sm:$0xff]  }
 0x14d   :  { %v831_v37 = vadd.f32 %v829_v35, %v817_v27  ;;  %v830_v38 = vmul.f32 0.044715, %v828_v36  ;;  %v1708_v35 = vld [vmem:[%s2233_s9] sm:$0xff]   ;;  %v16_v36 = vstv %s2234_s10 }
 0x14e   :  { %17 = vst [vmem:[#allocation2] sm:$0x1] %v16_v36 }
 0x14f   :  { %v833_v39 = vmul.f32 0.7978846, %v831_v37  ;;  %v832_v40 = vadd.f32 %v830_v38, %v819_v31  ;;  %v1440_v37 = vld [vmem:[%s2235_s8] ss:$0 sm:$0xff] }
 0x151   :  { %1709 = vtanh.f32 %v833_v39  ;;  %v834_v41 = vmul.f32 0.7978846, %v832_v40 }
 0x153   :  { %1711 = vtanh.f32 %v834_v41 }
 0x15e   :  { %v1710_v42 = vpop.eup %1709 }
 0x15f   :  { %v837_v43 = vadd.f32 1.0, %v1710_v42 }
 0x160   :  { %v1712_v44 = vpop.eup %1711 }
 0x161   :  { %v838_v47 = vadd.f32 1.0, %v1712_v44  ;;  %v839_v48 = vmul.f32 %v837_v43, %v823_v45 }
 0x163   :  { %v840_v49 = vmul.f32 %v838_v47, %v824_v46  ;;  %v841_v51 = vpack.c.bf16 %v839_v48, %v839_v48 }
 0x165   :  { %v842_v50 = vpack.c.bf16 %v840_v49, %v840_v49 }
 0x167   :  { %1010 = vmatprep.mubr.bf16.mxu1 %v842_v50 }
 0x168   :  { %1011 = vmatmul.mubr.bf16.vlgmr.msra.gmra.mxu1 %v841_v51 }
 0x169   :  { %1490 = vmatpush3.bf16.msra.mxu1 %v1695_v52  ;;  %1505 = vmatprep.mubr.msk.bf16.mxu1 %vm1721_vm1, %v1720_v53 }
 0x16a   :  { %1491 = vmatprep.subr.bf16.mxu1 %v1720_v53 }
 0x16d   :  { %1492 = vmatpush3.bf16.msra.mxu1 %v1696_v54 }
 0x16e   :  { %1493 = vmatprep.subr.bf16.mxu1 %v1720_v53 }
 0x171   :  { %1494 = vmatpush3.bf16.msra.mxu1 %v1697_v55 }
 0x172   :  { %1495 = vmatprep.subr.bf16.mxu1 %v1720_v53 }
 0x175   :  { %1496 = vmatpush3.bf16.msra.mxu1 %v1698_v56 }
 0x176   :  { %1497 = vmatprep.subr.bf16.mxu1 %v1720_v53 }
 0x179   :  { %1498 = vmatpush3.bf16.msra.mxu1 %v1699_v57 }
 0x17a   :  { %1499 = vmatprep.subr.bf16.mxu1 %v1720_v53 }
 0x17d   :  { %1500 = vmatpush3.bf16.msra.mxu1 %v1700_v58 }
 0x17e   :  { %1501 = vmatprep.subr.bf16.mxu1 %v1720_v53 }
 0x181   :  { %1502 = vmatpush3.bf16.msra.mxu1 %v1701_v59 }
 0x182   :  { %1503 = vmatprep.subr.bf16.mxu1 %v1720_v53 }
 0x185   :  { %1504 = vmatpush3.bf16.msra.mxu1 %v1702_v60 }
 0x186   :  { %1521 = vmatprep.subr.bf16.mxu1 %v1720_v53 }
 0x228   :  { %v1466_v61 = vpop.f32.mrf.mxu1 }
 0x22a   :  { %v1467_v63 = vpop.f32.mrf.mxu1 }
 0x22b   :  { %v1468_v0 = vadd.f32 %v1467_v63, %v1466_v61 }
 0x22c   :  { %v1469_v1 = vpop.f32.mrf.mxu1 }
 0x22d   :  { %v1013_v2 = vadd.f32 %v1468_v0, %v1414_v62 }
 0x22e   :  { %v1470_v3 = vpop.f32.mrf.mxu1 }
 0x22f   :  { %v1019_v4 = vmul.f32 %v1013_v2, %v1013_v2  ;;  %v1018_v10 = vmul.f32 0.5, %v1013_v2 }
 0x231   :  { %v1020_v5 = vmul.f32 %v1019_v4, %v1013_v2 }
 0x233   :  { %v1021_v6 = vmul.f32 0.044715, %v1020_v5 }
 0x235   :  { %v1022_v7 = vadd.f32 %v1021_v6, %v1013_v2 }
 0x237   :  { %v1023_v8 = vmul.f32 0.7978846, %v1022_v7 }
 0x239   :  { %1713 = vtanh.f32 %v1023_v8 }
 0x246   :  { %v1714_v9 = vpop.eup %1713 }
 0x247   :  { %v1025_v11 = vadd.f32 1.0, %v1714_v9 }
 0x249   :  { %v1026_v12 = vmul.f32 %v1025_v11, %v1018_v10 }
 0x24b   :  { %v1027_v13 = vpack.c.bf16 %v1026_v12, %v1026_v12 }
 0x24d   :  { %1506 = vmatmul.mubr.bf16.vlgmr.msra.gmra.mxu1 %v1027_v13 }
 0x24e   :  { %1525 = vmatprep.mubr.msk.bf16.mxu1 %vm1721_vm1, %v1720_v53  ;;  %1522 = vmatpush3.bf16.msra.mxu1 %v1707_v34 }
 0x24f   :  { %1523 = vmatprep.subr.bf16.mxu1 %v1720_v53  ;;  %v1446_v53 = vld [vmem:[#allocation2] ss:$0 sm:$0xff] }
 0x252   :  { %1524 = vmatpush3.bf16.msra.mxu1 %v1708_v35 }
 0x30d   :  { %v1133_v19 = vpop.f32.mrf.mxu1 }
 0x30e   :  { %v1134_v20 = vadd.f32 %v1431_v18, %v1133_v19 }
 0x30f   :  { %v1507_v21 = vpop.f32.mrf.mxu1 }
 0x310   :  { %v1140_v22 = vmul.f32 %v1134_v20, %v1134_v20  ;;  %v1139_v30 = vmul.f32 0.5, %v1134_v20 }
 0x311   :  { %v1136_v23 = vpop.f32.mrf.mxu1 }
 0x312   :  { %v1141_v24 = vmul.f32 %v1140_v22, %v1134_v20 }
 0x313   :  { %v1508_v25 = vpop.f32.mrf.mxu1 }
 0x314   :  { %v1142_v26 = vmul.f32 0.044715, %v1141_v24 }
 0x316   :  { %v1143_v27 = vadd.f32 %v1142_v26, %v1134_v20 }
 0x318   :  { %v1144_v28 = vmul.f32 0.7978846, %v1143_v27 }
 0x31a   :  { %1715 = vtanh.f32 %v1144_v28 }
 0x327   :  { %v1716_v29 = vpop.eup %1715 }
 0x328   :  { %v1146_v31 = vadd.f32 1.0, %v1716_v29 }
 0x32a   :  { %v1147_v32 = vmul.f32 %v1146_v31, %v1139_v30 }
 0x32c   :  { %v1148_v33 = vpack.c.bf16 %v1147_v32, %v1147_v32 }
 0x32e   :  { %1518 = vmatmul.mubr.msk.bf16.vlgmr.msra.gmra.mxu0 %vm1188_vm2, %v1148_v33 }
 0x3ee   :  { %v1226_v38 = vpop.f32.mrf.mxu0 }
 0x3ef   :  { %v1227_v39 = vadd.f32 %v1440_v37, %v1226_v38 }
 0x3f0   :  { %v1519_v40 = vpop.f32.mrf.mxu0 }
 0x3f1   :  { %v1233_v41 = vmul.f32 %v1227_v39, %v1227_v39  ;;  %v1232_v49 = vmul.f32 0.5, %v1227_v39 }
 0x3f2   :  { %v1229_v42 = vpop.f32.mrf.mxu0 }
 0x3f3   :  { %v1234_v43 = vmul.f32 %v1233_v41, %v1227_v39 }
 0x3f4   :  { %v1520_v44 = vpop.f32.mrf.mxu0 }
 0x3f5   :  { %v1235_v45 = vmul.f32 0.044715, %v1234_v43 }
 0x3f7   :  { %v1236_v46 = vadd.f32 %v1235_v45, %v1227_v39 }
 0x3f9   :  { %v1237_v47 = vmul.f32 0.7978846, %v1236_v46 }
 0x3fb   :  { %1717 = vtanh.f32 %v1237_v47 }
 0x408   :  { %v1718_v48 = vpop.eup %1717 }
 0x409   :  { %v1239_v50 = vadd.f32 1.0, %v1718_v48 }
 0x40b   :  { %v1240_v51 = vmul.f32 %v1239_v50, %v1232_v49 }
 0x40d   :  { %v1241_v52 = vpack.c.bf16 %v1240_v51, %v1240_v51 }
 0x40f   :  { %1526 = vmatmul.mubr.msk.bf16.vlgmr.msra.gmra.mxu1 %vm1265_vm3, %v1241_v52 }
 0x4cf   :  { %v1303_v54 = vpop.f32.mrf.mxu1 }
 0x4d0   :  { %v1304_v55 = vadd.f32 %v1446_v53, %v1303_v54 }
 0x4d1   :  { %v1527_v56 = vpop.f32.mrf.mxu1 }
 0x4d2   :  { %1310 = vst.msk [vmem:[%s2236_s11] sm:$0xff] %vm1309_vm4, %v1304_v55 }
 0x4d3   :  { %v1306_v57 = vpop.f32.mrf.mxu1 }
 0x4d5   :  { %v1528_v58 = vpop.f32.mrf.mxu1 }

</bundles_post_ra>
